<compile_context>
chip_gen: v5e
topology: v5e:2x2
jax: 0.10.0
libtpu: 0.0.40
codegen_flags: <defaults>
</compile_context>

<pallas_src>
import functools

import jax
import jax.numpy as jnp
from jax.experimental import pallas as pl
from jax.experimental.pallas import tpu as pltpu


def _round_up(x, m):
    return (x + m - 1) // m * m


def _edge_conv_kernel(xi_ref, xj_ref, wa_ref, wb_ref, b_ref, o_ref, *, K):
    """One block of TN nodes.

    xi_ref : (TN, C)       per-node center features      (identity-center fast path)   OR
             (TN*K, C)     gathered center features      (general path)
    xj_ref : (TN*K, C)     gathered neighbor features (flattened over K)
    wa_ref : (C, Op)       (W1 - W2)^T   — acts on x_i
    wb_ref : (C, Op)       W2^T          — acts on x_j
    b_ref  : (1, Op)       bias (zero-padded to Op lanes)
    o_ref  : (TN, Op)      max-over-K output
    """
    TN, Op = o_ref.shape

    # Single big 2-D matmuls on the MXU (f32 accumulation), bias fused into the x_j term.
    hj = jnp.dot(xj_ref[...], wb_ref[...], preferred_element_type=jnp.float32)  # (TN*K, Op)
    hj = hj + b_ref[...]
    hi = jnp.dot(xi_ref[...], wa_ref[...], preferred_element_type=jnp.float32)

    hj3 = hj.reshape(TN, K, Op)
    if xi_ref.shape[0] == TN:
        # centers are the identity mapping: broadcast the per-node term across K
        h = hj3 + hi[:, None, :]
    else:
        h = hj3 + hi.reshape(TN, K, Op)

    h = jnp.maximum(h, 0.0)                                  # ReLU (BasicConv act='relu')
    o_ref[...] = jnp.max(h, axis=1).astype(o_ref.dtype)      # max over K neighbors


def _batched_gather(feat, idx):
    """feat: (B, N, C), idx: (B, N, K) -> (B, N, K, C)  (batched_index_select)."""
    return jax.vmap(lambda f, i: f[i])(feat, idx)


@functools.partial(jax.jit,
                   static_argnames=("block_n", "identity_centers", "input_dtype"))
def _edge_conv_impl(x, edge_index, weight, bias, *, block_n, identity_centers,
                    input_dtype):
    B, C, N, _ = x.shape
    Cout = weight.shape[0]
    K = edge_index.shape[-1]
    M = B * N

    # --- channels-last features -------------------------------------------------
    feat = jnp.transpose(x[:, :, :, 0], (0, 2, 1))           # (B, N, C)

    # --- fold the weight algebra + pad output channels to a lane-dense width ----
    w1 = weight[:, :C]                                       # (Cout, C) acts on x_i
    w2 = weight[:, C:]                                       # (Cout, C) acts on x_j - x_i
    Op = _round_up(Cout, 128)
    wa = jnp.pad(jnp.transpose(w1 - w2), ((0, 0), (0, Op - Cout)))   # (C, Op)
    wb = jnp.pad(jnp.transpose(w2), ((0, 0), (0, Op - Cout)))        # (C, Op)
    b2d = jnp.pad(bias.reshape(1, Cout), ((0, 0), (0, Op - Cout)))   # (1, Op)

    # --- node tiling (big blocks to amortize per-grid-step overhead) ------------
    bn = max(8, min(block_n, _round_up(M, 8)))
    bn = (bn // 8) * 8                                       # sublane-aligned
    M_pad = _round_up(M, bn)
    grid = (M_pad // bn,)

    # --- neighbor gather: plain-JAX glue (data-dependent indexing) --------------
    # TODO(synk): for large graphs the gather could move in-kernel via
    # PrefetchScalarGridSpec scalar-prefetched indices with feat resident in VMEM,
    # eliminating the HBM round-trip of x_j; kept in JAX here for generality.
    x_j = _batched_gather(feat, edge_index[0]).reshape(M, K, C)
    x_j = jnp.pad(x_j, ((0, M_pad - M), (0, 0), (0, 0))).reshape(M_pad * K, C)

    if identity_centers:
        # edge_index[1] == arange -> skip the K-fold replicated x_i gather entirely.
        x_i = jnp.pad(feat.reshape(M, C), ((0, M_pad - M), (0, 0)))          # (M_pad, C)
        xi_block_rows = bn
    else:
        x_i = _batched_gather(feat, edge_index[1]).reshape(M, K, C)
        x_i = jnp.pad(x_i, ((0, M_pad - M), (0, 0), (0, 0))).reshape(M_pad * K, C)
        xi_block_rows = bn * K

    # Optional bf16 inputs (halves HBM/VMEM for the dominant arrays; f32 accumulation).
    x_i = x_i.astype(input_dtype)
    x_j = x_j.astype(input_dtype)
    wa = wa.astype(input_dtype)
    wb = wb.astype(input_dtype)

    out = pl.pallas_call(
        functools.partial(_edge_conv_kernel, K=K),
        out_shape=jax.ShapeDtypeStruct((M_pad, Op), jnp.float32),
        grid=grid,
        in_specs=[
            pl.BlockSpec((xi_block_rows, C), lambda i: (i, 0)),
            pl.BlockSpec((bn * K, C), lambda i: (i, 0)),
            # grid-invariant weights / bias: constant block index -> no re-DMA per step
            pl.BlockSpec((C, Op), lambda i: (0, 0)),
            pl.BlockSpec((C, Op), lambda i: (0, 0)),
            pl.BlockSpec((1, Op), lambda i: (0, 0)),
        ],
        out_specs=pl.BlockSpec((bn, Op), lambda i: (i, 0)),
        compiler_params=pltpu.CompilerParams(
            dimension_semantics=("parallel",),          # megacore-shardable on v7x
            vmem_limit_bytes=64 * 1024 * 1024,          # size block_n down on v7x if needed
        ),
    )(x_i, x_j, wa, wb, b2d)

    out = out[:M, :Cout].reshape(B, N, Cout)
    return jnp.transpose(out, (0, 2, 1))[..., None]          # (B, Cout, N, 1)


def graph_conv2d_edge(x, edge_index, weight, bias, *, block_n=512,
                      input_dtype=jnp.float32):
    """EdgeConv2d forward.

    x          : (B, C, N, 1) float32
    edge_index : (2, B, N, K) int32   (row 1 = center idx, row 0 = neighbor idx)
    weight     : (Cout, 2*C)  float32 (1x1 conv weight, squeezed)
    bias       : (Cout,)      float32
    returns    : (B, Cout, N, 1) float32
    """
    N = x.shape[2]
    centers = edge_index[1]
    arange = jnp.arange(N, dtype=centers.dtype)[None, :, None]
    # Host-side (outside jit) check: is edge_index[1] the usual identity mapping?
    identity_centers = bool(jnp.all(centers == arange))
    return _edge_conv_impl(x, edge_index, weight, bias, block_n=block_n,
                           identity_centers=identity_centers,
                           input_dtype=input_dtype)


def _reference(x, edge_index, weight, bias):
    """Pure-JAX reference matching the PyTorch EdgeConv2d forward."""
    B, C, N, _ = x.shape
    feat = jnp.transpose(x[:, :, :, 0], (0, 2, 1))            # (B, N, C)
    x_i = _batched_gather(feat, edge_index[1])                # (B, N, K, C)
    x_j = _batched_gather(feat, edge_index[0])
    cat = jnp.concatenate([x_i, x_j - x_i], axis=-1)          # (B, N, K, 2C)
    h = jnp.einsum('bnkc,oc->bnko', cat, weight) + bias
    h = jnp.maximum(h, 0.0)
    out = jnp.max(h, axis=2)                                  # (B, N, Cout)
    return jnp.transpose(out, (0, 2, 1))[..., None]


if __name__ == "__main__":
    key = jax.random.PRNGKey(0)
    k_x, k_w, k_b, k_e, k_c = jax.random.split(key, 5)

    B, C, N, K = 2, 4, 16, 8
    Cout = 8

    # inputs (NCHW, matching PyTorch): x is (B, C, N, 1)
    x = jax.random.normal(k_x, (B, C, N, 1), dtype=jnp.float32)
    neighbors = jax.random.randint(k_e, (B, N, K), 0, N, dtype=jnp.int32)

    # deterministic parameter init (Conv2d 1x1: weight (Cout, 2C, 1, 1) -> (Cout, 2C))
    weight = 0.1 * jax.random.normal(k_w, (Cout, 2 * C), dtype=jnp.float32)
    bias = 0.1 * jax.random.normal(k_b, (Cout,), dtype=jnp.float32)

    # --- case 1: usual EdgeConv convention, edge_index[1] = arange (fast path) ---
    centers = jnp.broadcast_to(jnp.arange(N, dtype=jnp.int32)[None, :, None], (B, N, K))
    edge_index = jnp.stack([neighbors, centers], axis=0)
    out = jax.block_until_ready(graph_conv2d_edge(x, edge_index, weight, bias))
    ref = _reference(x, edge_index, weight, bias)
    assert out.shape == (B, Cout, N, 1), out.shape
    assert jnp.allclose(out, ref, atol=1e-5, rtol=1e-5), "mismatch vs reference (identity)"

    # --- case 2: arbitrary center indices (general gathered-x_i path) ------------
    centers2 = jax.random.randint(k_c, (B, N, K), 0, N, dtype=jnp.int32)
    edge_index2 = jnp.stack([neighbors, centers2], axis=0)
    out2 = jax.block_until_ready(graph_conv2d_edge(x, edge_index2, weight, bias))
    ref2 = _reference(x, edge_index2, weight, bias)
    assert jnp.allclose(out2, ref2, atol=1e-5, rtol=1e-5), "mismatch vs reference (general)"

    print("KERNEL_OK")
</pallas_src>

<mosaic_0001>
module attributes {stable_mosaic.version = 11 : i64} {
  func.func @_edge_conv_kernel(%arg0: i32, %arg1: memref<32x4xf32, #tpu.memory_space<vmem>>, %arg2: memref<256x4xf32, #tpu.memory_space<vmem>>, %arg3: memref<4x128xf32, #tpu.memory_space<vmem>>, %arg4: memref<4x128xf32, #tpu.memory_space<vmem>>, %arg5: memref<1x128xf32, #tpu.memory_space<vmem>>, %arg6: memref<32x128xf32, #tpu.memory_space<vmem>>) attributes {dimension_semantics = [#tpu.dimension_semantics<parallel>], iteration_bounds = array<i64: 1>, scalar_prefetch = 0 : i64, scratch_operands = 0 : i64, tpu.core_type = #tpu.core_type<tc>, window_params = [{transform_indices = @transform_0, window_bounds = array<i64: 32, 4>}, {transform_indices = @transform_1, window_bounds = array<i64: 256, 4>}, {pipeline_mode = #tpu.pipeline_mode<synchronous>, transform_indices = @transform_2, window_bounds = array<i64: 4, 128>}, {pipeline_mode = #tpu.pipeline_mode<synchronous>, transform_indices = @transform_3, window_bounds = array<i64: 4, 128>}, {pipeline_mode = #tpu.pipeline_mode<synchronous>, transform_indices = @transform_4, window_bounds = array<i64: 1, 128>}, {transform_indices = @transform_5, window_bounds = array<i64: 32, 128>}]} {
    %c0 = arith.constant 0 : index
    %c0_0 = arith.constant 0 : index
    %0 = vector.load %arg2[%c0, %c0_0] : memref<256x4xf32, #tpu.memory_space<vmem>>, vector<256x4xf32>
    %c0_1 = arith.constant 0 : index
    %c0_2 = arith.constant 0 : index
    %1 = vector.load %arg4[%c0_1, %c0_2] : memref<4x128xf32, #tpu.memory_space<vmem>>, vector<4x128xf32>
    %cst = arith.constant dense<0.000000e+00> : vector<256x128xf32>
    %2 = tpu.matmul %0, %1, %cst {dimension_numbers = #tpu.dot_dimension_numbers<[1], [0], [0], [1], [0, 0, 1, 1], [], []>} : vector<256x4xf32>, vector<4x128xf32>, vector<256x128xf32> -> vector<256x128xf32>
    %c0_3 = arith.constant 0 : index
    %c0_4 = arith.constant 0 : index
    %3 = vector.load %arg5[%c0_3, %c0_4] : memref<1x128xf32, #tpu.memory_space<vmem>>, vector<1x128xf32>
    %4 = vector.broadcast %3 : vector<1x128xf32> to vector<256x128xf32>
    %5 = arith.addf %2, %4 : vector<256x128xf32>
    %c0_5 = arith.constant 0 : index
    %c0_6 = arith.constant 0 : index
    %6 = vector.load %arg1[%c0_5, %c0_6] : memref<32x4xf32, #tpu.memory_space<vmem>>, vector<32x4xf32>
    %c0_7 = arith.constant 0 : index
    %c0_8 = arith.constant 0 : index
    %7 = vector.load %arg3[%c0_7, %c0_8] : memref<4x128xf32, #tpu.memory_space<vmem>>, vector<4x128xf32>
    %cst_9 = arith.constant dense<0.000000e+00> : vector<32x128xf32>
    %8 = tpu.matmul %6, %7, %cst_9 {dimension_numbers = #tpu.dot_dimension_numbers<[1], [0], [0], [1], [0, 0, 1, 1], [], []>} : vector<32x4xf32>, vector<4x128xf32>, vector<32x128xf32> -> vector<32x128xf32>
    %9 = vector.shape_cast %5 : vector<256x128xf32> to vector<32x8x128xf32>
    %10 = vector.shape_cast %8 : vector<32x128xf32> to vector<32x1x128xf32>
    %11 = vector.broadcast %10 : vector<32x1x128xf32> to vector<32x8x128xf32>
    %12 = arith.addf %9, %11 : vector<32x8x128xf32>
    %cst_10 = arith.constant 0.000000e+00 : f32
    %13 = vector.broadcast %cst_10 : f32 to vector<32x8x128xf32>
    %14 = arith.maximumf %12, %13 : vector<32x8x128xf32>
    %cst_11 = arith.constant dense<0xFF800000> : vector<32x128xf32>
    %15 = vector.multi_reduction <maximumf>, %14, %cst_11 [1] : vector<32x8x128xf32> to vector<32x128xf32>
    %c0_12 = arith.constant 0 : index
    %c0_13 = arith.constant 0 : index
    %16 = vector.load %arg6[%c0_12, %c0_13] : memref<32x128xf32, #tpu.memory_space<vmem>>, vector<32x128xf32>
    tpu.vector_store %arg6[%c0_12, %c0_13], %15 {strides = array<i32>} : memref<32x128xf32, #tpu.memory_space<vmem>>, vector<32x128xf32>,
    return
  }
  func.func @transform_0(%arg0: i32) -> (i32, i32) {
    %c0_i32 = arith.constant 0 : i32
    %c0_i32_0 = arith.constant 0 : i32
    return %arg0, %c0_i32 : i32, i32
  }
  func.func @transform_1(%arg0: i32) -> (i32, i32) {
    %c0_i32 = arith.constant 0 : i32
    %c0_i32_0 = arith.constant 0 : i32
    return %arg0, %c0_i32 : i32, i32
  }
  func.func @transform_2(%arg0: i32) -> (i32, i32) {
    %c0_i32 = arith.constant 0 : i32
    %c0_i32_0 = arith.constant 0 : i32
    %c0_i32_1 = arith.constant 0 : i32
    return %c0_i32, %c0_i32_0 : i32, i32
  }
  func.func @transform_3(%arg0: i32) -> (i32, i32) {
    %c0_i32 = arith.constant 0 : i32
    %c0_i32_0 = arith.constant 0 : i32
    %c0_i32_1 = arith.constant 0 : i32
    return %c0_i32, %c0_i32_0 : i32, i32
  }
  func.func @transform_4(%arg0: i32) -> (i32, i32) {
    %c0_i32 = arith.constant 0 : i32
    %c0_i32_0 = arith.constant 0 : i32
    %c0_i32_1 = arith.constant 0 : i32
    return %c0_i32, %c0_i32_0 : i32, i32
  }
  func.func @transform_5(%arg0: i32) -> (i32, i32) {
    %c0_i32 = arith.constant 0 : i32
    %c0_i32_0 = arith.constant 0 : i32
    return %arg0, %c0_i32 : i32, i32
  }
}

</mosaic_0001>

<bundles_post_ra>
// kernel: _edge_conv_impl.1
= control target key start
LH: loop header
LB: loop body
LE: loop exit
PB: predicated region body
PF: predicated region fallthrough
CT: control target
= control target key end

     0   :  { %vm154_vm0 = vcmask 1043456   ;;  %vm57_vm1 = vcmask 31744   ;;  %vm704_vm2 = vcmask 1041409   ;;  %vm706_vm3 = vcmask 1042434   ;;  %s1225_s3 = inlined_call_operand.vmem [shape: f32[4,128], index: 3, kind: input, shape index: {}]   ;;  %s1226_s1 = inlined_call_operand.vmem [shape: f32[256,4], index: 1, kind: input, shape index: {}]   ;;  %s1227_s2 = inlined_call_operand.vmem [shape: f32[4,128], index: 2, kind: input, shape index: {}]   ;;  %s1228_s4 = inlined_call_operand.vmem [shape: f32[1,128], index: 4, kind: input, shape index: {}]   ;;  %s1229_s0 = inlined_call_operand.vmem [shape: f32[32,4], index: 0, kind: input, shape index: {}]   ;;  %s1230_s5 = inlined_call_operand.vmem [shape: f32[32,128], index: 5, kind: output, shape index: {}]  }
   0x1   :  { %v52_v0 = vld [vmem:[%s1225_s3] sm:$0xf]  ;;  %v29_v2 = vld [vmem:[%s1226_s1 + $0x48] sm:$0xff]  ;;  %v34_v3 = vld [vmem:[%s1226_s1 + $0x70] sm:$0xff]  ;;  %vm708_vm4 = vcmask 1043459   ;;  %vm710_vm5 = vcmask 1044484  }
   0x2   :  { %v20_v1 = vld [vmem:[%s1226_s1] sm:$0xff]  ;;  %751 = vmatpush.msk.msra.mxu0 %vm154_vm0, %v52_v0  ;;  %789 = vmatpush.msk.msra.mxu1 %vm154_vm0, %v52_v0  ;;  %v43_v4 = vld [vmem:[%s1226_s1 + $0xb8] sm:$0xff]  ;;  %v21_v6 = vld [vmem:[%s1226_s1 + $0x8] sm:$0xff]  ;;  %vm712_vm6 = vcmask 1045509   ;;  %vm714_vm7 = vcmask 1046534   ;;  %vm716_vm8 = vcmask 1047559  }
   0x3   :  { %790 = vmatpush.msk.msra.mxu2 %vm154_vm0, %v52_v0  ;;  %791 = vmatpush.msk.msra.mxu3 %vm154_vm0, %v52_v0  ;;  %v275_v5 = vld [vmem:[%s1227_s2] sm:$0xf]  ;;  %v30_v7 = vld [vmem:[%s1226_s1 + $0x50] sm:$0xff]  ;;  %v35_v8 = vld [vmem:[%s1226_s1 + $0x78] sm:$0xff] }
   0x4   :  { %752 = vmatmul.msk.f32.vlgmr.msra.gmra.mxu0 %vm57_vm1, %v20_v1  ;;  %761 = vmatmul.msk.f32.vlgmr.msra.gmra.mxu1 %vm57_vm1, %v29_v2  ;;  %v44_v9 = vld [vmem:[%s1226_s1 + $0xc0] sm:$0xff]  ;;  %v22_v10 = vld [vmem:[%s1226_s1 + $0x10] sm:$0xff]  ;;  %v31_v11 = vld [vmem:[%s1226_s1 + $0x58] sm:$0xff] }
   0x5   :  { %766 = vmatmul.msk.f32.vlgmr.msra.gmra.mxu2 %vm57_vm1, %v34_v3  ;;  %775 = vmatmul.msk.f32.vlgmr.msra.gmra.mxu3 %vm57_vm1, %v43_v4  ;;  %v36_v12 = vld [vmem:[%s1226_s1 + $0x80] sm:$0xff]  ;;  %v45_v13 = vld [vmem:[%s1226_s1 + $0xc8] sm:$0xff]  ;;  %v23_v14 = vld [vmem:[%s1226_s1 + $0x18] sm:$0xff] }
   0x6   :  { %784 = vmatpush.msk.msrb.mxu1 %vm154_vm0, %v275_v5  ;;  %v32_v15 = vld [vmem:[%s1226_s1 + $0x60] sm:$0xff]  ;;  %v37_v16 = vld [vmem:[%s1226_s1 + $0x88] sm:$0xff]  ;;  %v46_v17 = vld [vmem:[%s1226_s1 + $0xd0] sm:$0xff] }
   0x7   :  { %v24_v18 = vld [vmem:[%s1226_s1 + $0x20] sm:$0xff]  ;;  %v33_v19 = vld [vmem:[%s1226_s1 + $0x68] sm:$0xff]  ;;  %v38_v20 = vld [vmem:[%s1226_s1 + $0x90] sm:$0xff] }
   0x8   :  { %v47_v21 = vld [vmem:[%s1226_s1 + $0xd8] sm:$0xff]  ;;  %v25_v22 = vld [vmem:[%s1226_s1 + $0x28] sm:$0xff]  ;;  %v271_v23 = vld [vmem:[%s1229_s0] sm:$0xff] }
   0x9   :  { %v39_v24 = vld [vmem:[%s1226_s1 + $0x98] sm:$0xff]  ;;  %v48_v25 = vld [vmem:[%s1226_s1 + $0xe0] sm:$0xff]  ;;  %v26_v26 = vld [vmem:[%s1226_s1 + $0x30] sm:$0xff] }
   0xa   :  { %v272_v27 = vld [vmem:[%s1229_s0 + $0x8] sm:$0xff]  ;;  %v40_v28 = vld [vmem:[%s1226_s1 + $0xa0] sm:$0xff]  ;;  %v27_v30 = vld [vmem:[%s1226_s1 + $0x38] sm:$0xff] }
   0xb   :  { %v49_v29 = vld [vmem:[%s1226_s1 + $0xe8] sm:$0xff]  ;;  %v273_v31 = vld [vmem:[%s1229_s0 + $0x10] sm:$0xff]  ;;  %v28_v34 = vld [vmem:[%s1226_s1 + $0x40] sm:$0xff] }
   0xc   :  { %753 = vmatmul.msk.f32.gmra.mxu0 %vm57_vm1, %v21_v6  ;;  %762 = vmatmul.msk.f32.gmra.mxu1 %vm57_vm1, %v30_v7  ;;  %v41_v32 = vld [vmem:[%s1226_s1 + $0xa8] sm:$0xff]  ;;  %v50_v33 = vld [vmem:[%s1226_s1 + $0xf0] sm:$0xff]  ;;  %v274_v35 = vld [vmem:[%s1229_s0 + $0x18] sm:$0xff] }
   0xd   :  { %767 = vmatmul.msk.f32.gmra.mxu2 %vm57_vm1, %v35_v8  ;;  %776 = vmatmul.msk.f32.gmra.mxu3 %vm57_vm1, %v44_v9  ;;  %v42_v36 = vld [vmem:[%s1226_s1 + $0xb0] sm:$0xff]  ;;  %v51_v37 = vld [vmem:[%s1226_s1 + $0xf8] sm:$0xff]  ;;  %v981_v38 = vld [vmem:[%s1228_s4] ss:$0 sm:$0xff] }
  0x14   :  { %754 = vmatmul.msk.f32.gmra.mxu0 %vm57_vm1, %v22_v10  ;;  %763 = vmatmul.msk.f32.gmra.mxu1 %vm57_vm1, %v31_v11 }
  0x15   :  { %768 = vmatmul.msk.f32.gmra.mxu2 %vm57_vm1, %v36_v12  ;;  %777 = vmatmul.msk.f32.gmra.mxu3 %vm57_vm1, %v45_v13 }
  0x1c   :  { %755 = vmatmul.msk.f32.gmra.mxu0 %vm57_vm1, %v23_v14  ;;  %764 = vmatmul.msk.f32.gmra.mxu1 %vm57_vm1, %v32_v15 }
  0x1d   :  { %769 = vmatmul.msk.f32.gmra.mxu2 %vm57_vm1, %v37_v16  ;;  %778 = vmatmul.msk.f32.gmra.mxu3 %vm57_vm1, %v46_v17 }
  0x24   :  { %756 = vmatmul.msk.f32.gmra.mxu0 %vm57_vm1, %v24_v18  ;;  %765 = vmatmul.msk.f32.gmra.mxu1 %vm57_vm1, %v33_v19 }
  0x25   :  { %770 = vmatmul.msk.f32.gmra.mxu2 %vm57_vm1, %v38_v20  ;;  %779 = vmatmul.msk.f32.gmra.mxu3 %vm57_vm1, %v47_v21 }
  0x2c   :  { %757 = vmatmul.msk.f32.gmra.mxu0 %vm57_vm1, %v25_v22  ;;  %785 = vmatmul.msk.f32.vlgmr.msrb.gmra.mxu1 %vm57_vm1, %v271_v23 }
  0x2d   :  { %771 = vmatmul.msk.f32.gmra.mxu2 %vm57_vm1, %v39_v24  ;;  %780 = vmatmul.msk.f32.gmra.mxu3 %vm57_vm1, %v48_v25 }
  0x34   :  { %758 = vmatmul.msk.f32.gmra.mxu0 %vm57_vm1, %v26_v26  ;;  %786 = vmatmul.msk.f32.gmra.mxu1 %vm57_vm1, %v272_v27 }
  0x35   :  { %772 = vmatmul.msk.f32.gmra.mxu2 %vm57_vm1, %v40_v28  ;;  %781 = vmatmul.msk.f32.gmra.mxu3 %vm57_vm1, %v49_v29 }
  0x3c   :  { %759 = vmatmul.msk.f32.gmra.mxu0 %vm57_vm1, %v27_v30  ;;  %787 = vmatmul.msk.f32.gmra.mxu1 %vm57_vm1, %v273_v31 }
  0x3d   :  { %773 = vmatmul.msk.f32.gmra.mxu2 %vm57_vm1, %v41_v32  ;;  %782 = vmatmul.msk.f32.gmra.mxu3 %vm57_vm1, %v50_v33 }
  0x44   :  { %760 = vmatmul.msk.f32.gmra.mxu0 %vm57_vm1, %v28_v34  ;;  %788 = vmatmul.msk.f32.gmra.mxu1 %vm57_vm1, %v274_v35 }
  0x45   :  { %774 = vmatmul.msk.f32.gmra.mxu2 %vm57_vm1, %v42_v36  ;;  %783 = vmatmul.msk.f32.gmra.mxu3 %vm57_vm1, %v51_v37 }
  0x81   :  { %v175_v39 = vpop.f32.mrf.mxu0  ;;  %v202_v40 = vpop.f32.mrf.mxu1 }
  0x82   :  { %v984_v41 = vadd.f32 %v981_v38, %v202_v40  ;;  %v176_v56 = vadd.f32 %v981_v38, %v175_v39 }
  0x88   :  { %v217_v44 = vpop.f32.mrf.mxu2  ;;  %v244_v47 = vpop.f32.mrf.mxu3 }
  0x89   :  { %v178_v42 = vpop.f32.mrf.mxu0  ;;  %v986_v43 = vpop.f32.mrf.mxu1  ;;  %v1019_v40 = vadd.f32 %v981_v38, %v217_v44 }
  0x8a   :  { %v179_v57 = vadd.f32 %v981_v38, %v178_v42 }
  0x90   :  { %v992_v50 = vpop.f32.mrf.mxu2  ;;  %v994_v51 = vpop.f32.mrf.mxu3 }
  0x91   :  { %v181_v45 = vpop.f32.mrf.mxu0  ;;  %v988_v46 = vpop.f32.mrf.mxu1  ;;  %v221_v44 = vadd.f32 %v981_v38, %v992_v50 }
  0x92   :  { %v182_v60 = vadd.f32 %v981_v38, %v181_v45 }
  0x98   :  { %v998_v54 = vpop.f32.mrf.mxu2  ;;  %v1000_v55 = vpop.f32.mrf.mxu3 }
  0x99   :  { %v184_v48 = vpop.f32.mrf.mxu0  ;;  %v990_v49 = vpop.f32.mrf.mxu1  ;;  %v1046_v50 = vadd.f32 %v981_v38, %v1000_v55 }
  0x9a   :  { %v185_v4 = vadd.f32 %v981_v38, %v184_v48  ;;  %v1022_v48 = vadd.f32 %v981_v38, %v244_v47  ;;  %v1032_v47 = vadd.f32 %v981_v38, %v994_v51 }
  0xa0   :  { %v226_v12 = vpop.f32.mrf.mxu2  ;;  %v253_v23 = vpop.f32.mrf.mxu3 }
  0xa1   :  { %v187_v52 = vpop.f32.mrf.mxu0  ;;  %v996_v53 = vpop.f32.mrf.mxu1 }
  0xa2   :  { %v188_v8 = vadd.f32 %v981_v38, %v187_v52 }
  0xa9   :  { %v190_v58 = vpop.f32.mrf.mxu0  ;;  %v1004_v59 = vpop.f32.mrf.mxu1 }
  0xaa   :  { %v324_v61 = vrot.slane %v1004_v59, 1  ;;  %v325_v62 = vrot.slane %v1004_v59, 2  ;;  %v326_v63 = vrot.slane %v1004_v59, 3  ;;  %v191_v0 = vadd.f32 %v981_v38, %v190_v58 }
  0xab   :  { %v327_v1 = vrot.slane %v1004_v59, 4  ;;  %v328_v2 = vrot.slane %v1004_v59, 5  ;;  %v352_v3 = vperm.slane %v1004_v59, 0  ;;  %v329_v16 = vrot.slane %v1004_v59, 6 }
  0xac   :  { %v353_v5 = vperm.slane %v324_v61, 0  ;;  %v354_v6 = vperm.slane %v325_v62, 0  ;;  %v355_v7 = vperm.slane %v326_v63, 0  ;;  %v1026_v63 = vadd.f32 %v981_v38, %v986_v43 }
  0xad   :  { %v356_v9 = vperm.slane %v327_v1, 0  ;;  %v357_v10 = vperm.slane %v328_v2, 0  ;;  %v416_v11 = vadd.f32 %v352_v3, %v176_v56  ;;  %v358_v31 = vperm.slane %v329_v16, 0 }
  0xae   :  { %v417_v13 = vadd.f32 %v353_v5, %v179_v57  ;;  %v418_v14 = vadd.f32 %v354_v6, %v182_v60  ;;  %v419_v15 = vadd.f32 %v355_v7, %v185_v4  ;;  %v1036_v3 = vadd.f32 %v981_v38, %v988_v46 }
  0xaf   :  { %v420_v17 = vadd.f32 %v356_v9, %v188_v8  ;;  %v421_v18 = vadd.f32 %v357_v10, %v191_v0  ;;  %v448_v19 = vmax.f32 %v416_v11, 0.0  ;;  %v229_v0 = vpop.f32.mrf.mxu2  ;;  %v1040_v4 = vadd.f32 %v981_v38, %v998_v54  ;;  %v256_v8 = vpop.f32.mrf.mxu3 }
  0xb0   :  { %v449_v20 = vmax.f32 %v417_v13, 0.0  ;;  %v450_v21 = vmax.f32 %v418_v14, 0.0  ;;  %v451_v22 = vmax.f32 %v419_v15, 0.0  ;;  %v1050_v6 = vadd.f32 %v981_v38, %v990_v49 }
  0xb1   :  { %v452_v24 = vmax.f32 %v420_v17, 0.0  ;;  %v453_v25 = vmax.f32 %v421_v18, 0.0  ;;  %v480_v26 = vrot.slane %v448_v19, 4  ;;  %v193_v27 = vpop.f32.mrf.mxu0  ;;  %v1042_v5 = vpop.f32.mrf.mxu1  ;;  %v1054_v14 = vadd.f32 %v981_v38, %v226_v12 }
  0xb2   :  { %v486_v28 = vrot.slane %v449_v20, 4  ;;  %v492_v29 = vrot.slane %v450_v21, 4  ;;  %v498_v30 = vrot.slane %v451_v22, 4  ;;  %v194_v35 = vadd.f32 %v981_v38, %v193_v27 }
  0xb3   :  { %v481_v32 = vmax.f32 %v448_v19, %v480_v26  ;;  %v504_v33 = vrot.slane %v452_v24, 4  ;;  %v510_v34 = vrot.slane %v453_v25, 4  ;;  %v335_v13 = vrot.slane %v1042_v5, 5 }
  0xb4   :  { %v487_v36 = vmax.f32 %v449_v20, %v486_v28  ;;  %v493_v37 = vmax.f32 %v450_v21, %v492_v29  ;;  %v499_v39 = vmax.f32 %v451_v22, %v498_v30  ;;  %v422_v45 = vadd.f32 %v358_v31, %v194_v35 }
  0xb5   :  { %v482_v42 = vrot.slane %v481_v32, 2  ;;  %v505_v57 = vmax.f32 %v452_v24, %v504_v33  ;;  %v511_v62 = vmax.f32 %v453_v25, %v510_v34  ;;  %v336_v49 = vrot.slane %v1042_v5, 6 }
  0xb6   :  { %v488_v52 = vrot.slane %v487_v36, 2  ;;  %v494_v56 = vrot.slane %v493_v37, 2  ;;  %v500_v60 = vrot.slane %v499_v39, 2  ;;  %v454_v61 = vmax.f32 %v422_v45, 0.0 }
  0xb7   :  { %v483_v58 = vmax.f32 %v481_v32, %v482_v42  ;;  %v506_v10 = vrot.slane %v505_v57, 2  ;;  %v512_v11 = vrot.slane %v511_v62, 2  ;;  %v1058_v15 = vadd.f32 %v981_v38, %v253_v23  ;;  %v232_v30 = vpop.f32.mrf.mxu2 }
  0xb8   :  { %v489_v1 = vmax.f32 %v487_v36, %v488_v52  ;;  %v495_v2 = vmax.f32 %v493_v37, %v494_v56  ;;  %v516_v43 = vrot.slane %v454_v61, 4  ;;  %v501_v9 = vmax.f32 %v499_v39, %v500_v60  ;;  %v259_v56 = vpop.f32.mrf.mxu3 }
  0xb9   :  { %v484_v51 = vrot.slane %v483_v58, 1  ;;  %v337_v17 = vrot.slane %v1042_v5, 7  ;;  %v507_v20 = vmax.f32 %v505_v57, %v506_v10  ;;  %v513_v21 = vmax.f32 %v511_v62, %v512_v11  ;;  %v196_v45 = vpop.f32.mrf.mxu0 }
  0xba   :  { %v490_v7 = vrot.slane %v489_v1, 1  ;;  %v496_v46 = vrot.slane %v495_v2, 1  ;;  %v517_v55 = vmax.f32 %v454_v61, %v516_v43  ;;  %v502_v19 = vrot.slane %v501_v9, 1 }
  0xbb   :  { %v485_v16 = vmax.f32 %v483_v58, %v484_v51  ;;  %v365_v24 = vperm.slane %v335_v13, 0  ;;  %v366_v12 = vperm.slane %v336_v49, 0  ;;  %v367_v25 = vperm.slane %v337_v17, 0 }
  0xbc   :  { %v491_v54 = vmax.f32 %v489_v1, %v490_v7  ;;  %v497_v18 = vmax.f32 %v495_v2, %v496_v46  ;;  %v215_v26 = vadd.f32 %v981_v38, %v996_v53  ;;  %v1065_v27 = vadd.f32 %v981_v38, %v229_v0 }
  0xbd   :  { %v518_v23 = vrot.slane %v517_v55, 2  ;;  %v330_v28 = vrot.slane %v1004_v59, 7  ;;  %v1069_v29 = vadd.f32 %v981_v38, %v256_v8  ;;  %v331_v31 = vrot.slane %v1042_v5, 1 }
  0xbe   :  { %v705_v22 = vsel %vm704_vm2, %v491_v54, %v485_v16  ;;  %v332_v32 = vrot.slane %v1042_v5, 2  ;;  %v334_v33 = vrot.slane %v1042_v5, 4  ;;  %v508_v34 = vrot.slane %v507_v20, 1 }
  0xbf   :  { %v707_v53 = vsel %vm706_vm3, %v497_v18, %v705_v22  ;;  %v430_v35 = vadd.f32 %v366_v12, %v1019_v40  ;;  %v431_v36 = vadd.f32 %v367_v25, %v221_v44  ;;  %v503_v37 = vmax.f32 %v501_v9, %v502_v19  ;;  %v1082_v44 = vpop.f32.mrf.mxu1  ;;  %v235_v12 = vpop.f32.mrf.mxu2 }
  0xc0   :  { %v514_v39 = vrot.slane %v513_v21, 1  ;;  %v333_v59 = vrot.slane %v1042_v5, 3  ;;  %v429_v42 = vadd.f32 %v365_v24, %v215_v26  ;;  %v233_v52 = vadd.f32 %v981_v38, %v232_v30 }
  0xc1   :  { %v519_v57 = vmax.f32 %v517_v55, %v518_v23  ;;  %v462_v58 = vmax.f32 %v430_v35, 0.0  ;;  %v359_v60 = vperm.slane %v330_v28, 0  ;;  %v1079_v61 = vadd.f32 %v981_v38, %v259_v56 }
  0xc2   :  { %v709_v62 = vsel %vm708_vm4, %v503_v37, %v707_v53  ;;  %v361_v0 = vperm.slane %v331_v31, 0  ;;  %v463_v40 = vmax.f32 %v431_v36, 0.0  ;;  %v509_v1 = vmax.f32 %v507_v20, %v508_v34 }
  0xc3   :  { %v362_v2 = vperm.slane %v332_v32, 0  ;;  %v364_v43 = vperm.slane %v334_v33, 0  ;;  %v197_v51 = vadd.f32 %v981_v38, %v196_v45  ;;  %v515_v7 = vmax.f32 %v513_v21, %v514_v39 }
  0xc4   :  { %v363_v8 = vperm.slane %v333_v59, 0  ;;  %v461_v46 = vmax.f32 %v429_v42, 0.0  ;;  %v564_v9 = vrot.slane %v462_v58, 4  ;;  %v520_v10 = vrot.slane %v519_v57, 1 }
  0xc5   :  { %v711_v11 = vsel %vm710_vm5, %v509_v1, %v709_v62  ;;  %v423_v54 = vadd.f32 %v359_v60, %v197_v51  ;;  %v338_v13 = vrot.slane %v1082_v44, 1  ;;  %v1088_v55 = vadd.f32 %v361_v0, %v984_v41 }
  0xc6   :  { %v570_v49 = vrot.slane %v463_v40, 4  ;;  %v339_v16 = vrot.slane %v1082_v44, 2  ;;  %v340_v17 = vrot.slane %v1082_v44, 3  ;;  %v1093_v18 = vadd.f32 %v362_v2, %v1026_v63 }
  0xc7   :  { %v428_v19 = vadd.f32 %v364_v43, %v1050_v6  ;;  %v455_v20 = vmax.f32 %v423_v54, 0.0  ;;  %v341_v21 = vrot.slane %v1082_v44, 4  ;;  %v558_v22 = vrot.slane %v461_v46, 4  ;;  %v199_v54 = vpop.f32.mrf.mxu0 }
  0xc8   :  { %v565_v24 = vmax.f32 %v462_v58, %v564_v9  ;;  %v368_v25 = vperm.slane %v1082_v44, 0  ;;  %v369_v41 = vperm.slane %v338_v13, 0  ;;  %v713_v26 = vsel %vm712_vm6, %v515_v7, %v711_v11 }
  0xc9   :  { %v427_v23 = vadd.f32 %v363_v8, %v1036_v3  ;;  %v522_v28 = vrot.slane %v455_v20, 4  ;;  %v370_v30 = vperm.slane %v339_v16, 0  ;;  %v521_v31 = vmax.f32 %v519_v57, %v520_v10  ;;  %v262_v10 = vpop.f32.mrf.mxu3 }
  0xca   :  { %v571_v63 = vmax.f32 %v463_v40, %v570_v49  ;;  %v371_v32 = vperm.slane %v340_v17, 0  ;;  %v372_v33 = vperm.slane %v341_v21, 0  ;;  %v460_v6 = vmax.f32 %v428_v19, 0.0 }
  0xcb   :  { %v236_v34 = vadd.f32 %v981_v38, %v235_v12  ;;  %v523_v53 = vmax.f32 %v455_v20, %v522_v28  ;;  %v432_v35 = vadd.f32 %v368_v25, %v1040_v4  ;;  %v559_v36 = vmax.f32 %v461_v46, %v558_v22  ;;  %v238_v28 = vpop.f32.mrf.mxu2 }
  0xcc   :  { %v566_v37 = vrot.slane %v565_v24, 2  ;;  %v433_v39 = vadd.f32 %v369_v41, %v1054_v14  ;;  %v434_v59 = vadd.f32 %v370_v30, %v1065_v27  ;;  %v458_v3 = vmax.f32 %v1093_v18, 0.0 }
  0xcd   :  { %v459_v42 = vmax.f32 %v427_v23, 0.0  ;;  %v524_v45 = vrot.slane %v523_v53, 2  ;;  %v344_v56 = vrot.slane %v1082_v44, 7  ;;  %v457_v57 = vmax.f32 %v1088_v55, 0.0 }
  0xce   :  { %v572_v58 = vrot.slane %v571_v63, 2  ;;  %v435_v60 = vadd.f32 %v371_v32, %v233_v52  ;;  %v436_v62 = vadd.f32 %v372_v33, %v236_v34  ;;  %v715_v0 = vsel %vm714_vm7, %v521_v31, %v713_v26 }
  0xcf   :  { %v525_v4 = vmax.f32 %v523_v53, %v524_v45  ;;  %v464_v40 = vmax.f32 %v432_v35, 0.0  ;;  %v465_v1 = vmax.f32 %v433_v39, 0.0  ;;  %v552_v2 = vrot.slane %v460_v6, 4 }
  0xd0   :  { %v560_v14 = vrot.slane %v559_v36, 2  ;;  %v567_v43 = vmax.f32 %v565_v24, %v566_v37  ;;  %v466_v27 = vmax.f32 %v434_v59, 0.0  ;;  %v540_v51 = vrot.slane %v458_v3, 4 }
  0xd1   :  { %v546_v7 = vrot.slane %v459_v42, 4  ;;  %v526_v8 = vrot.slane %v525_v4, 1  ;;  %v375_v46 = vperm.slane %v344_v56, 0  ;;  %v573_v9 = vmax.f32 %v571_v63, %v572_v58 }
  0xd2   :  { %v467_v52 = vmax.f32 %v435_v60, 0.0  ;;  %v468_v11 = vmax.f32 %v436_v62, 0.0  ;;  %v1111_v13 = vadd.f32 %v981_v38, %v262_v10  ;;  %v576_v49 = vrot.slane %v464_v40, 4  ;;  %v1142_v10 = vpop.f32.mrf.mxu1 }
  0xd3   :  { %v527_v55 = vmax.f32 %v525_v4, %v526_v8  ;;  %v582_v16 = vrot.slane %v465_v1, 4  ;;  %v553_v17 = vmax.f32 %v460_v6, %v552_v2  ;;  %v561_v19 = vmax.f32 %v559_v36, %v560_v14  ;;  %v265_v14 = vpop.f32.mrf.mxu3 }
  0xd4   :  { %v568_v20 = vrot.slane %v567_v43, 1  ;;  %v588_v21 = vrot.slane %v466_v27, 4  ;;  %v547_v22 = vmax.f32 %v459_v42, %v546_v7  ;;  %v1115_v12 = vadd.f32 %v375_v46, %v1022_v48 }
  0xd5   :  { %v717_v24 = vsel %vm716_vm8, %v527_v55, %v715_v0  ;;  %v200_v25 = vadd.f32 %v981_v38, %v199_v54  ;;  %v574_v41 = vrot.slane %v573_v9, 1  ;;  %v594_v26 = vrot.slane %v467_v52, 4 }
  0xd6   :  { %743 = vst [vmem:[%s1230_s5] sm:$0xff] %v717_v24  ;;  %v600_v23 = vrot.slane %v468_v11, 4  ;;  %v342_v30 = vrot.slane %v1082_v44, 5  ;;  %v577_v31 = vmax.f32 %v464_v40, %v576_v49  ;;  %v583_v63 = vmax.f32 %v465_v1, %v582_v16 }
  0xd7   :  { %v360_v32 = vperm.slane %v1042_v5, 0  ;;  %v534_v33 = vrot.slane %v457_v57, 4  ;;  %v554_v6 = vrot.slane %v553_v17, 2  ;;  %v562_v48 = vrot.slane %v561_v19, 1 }
  0xd8   :  { %v1123_v34 = vmax.f32 %v567_v43, %v568_v20  ;;  %v589_v53 = vmax.f32 %v466_v27, %v588_v21  ;;  %v471_v35 = vmax.f32 %v1115_v12, 0.0  ;;  %v239_v36 = vadd.f32 %v981_v38, %v238_v28 }
  0xd9   :  { %v424_v37 = vadd.f32 %v360_v32, %v200_v25  ;;  %v535_v39 = vmax.f32 %v457_v57, %v534_v33  ;;  %v1127_v59 = vmax.f32 %v573_v9, %v574_v41  ;;  %v1129_v42 = vmax.f32 %v467_v52, %v594_v26 }
  0xda   :  { %v373_v45 = vperm.slane %v342_v30, 0  ;;  %v1131_v56 = vmax.f32 %v468_v11, %v600_v23  ;;  %v578_v5 = vrot.slane %v577_v31, 2  ;;  %v584_v58 = vrot.slane %v583_v63, 2 }
  0xdb   :  { %v456_v60 = vmax.f32 %v424_v37, 0.0  ;;  %v536_v62 = vrot.slane %v535_v39, 2  ;;  %v590_v0 = vrot.slane %v589_v53, 2  ;;  %v541_v4 = vmax.f32 %v458_v3, %v540_v51 }
  0xdc   :  { %v548_v40 = vrot.slane %v547_v22, 2  ;;  %v555_v1 = vmax.f32 %v553_v17, %v554_v6  ;;  %v1137_v57 = vrot.slane %v471_v35, 4  ;;  %v1139_v2 = vadd.f32 %v373_v45, %v239_v36 }
  0xdd   :  { %v528_v43 = vrot.slane %v456_v60, 4  ;;  %v537_v27 = vmax.f32 %v535_v39, %v536_v62  ;;  %v266_v7 = vadd.f32 %v981_v38, %v265_v14  ;;  %v542_v8 = vrot.slane %v541_v4, 2 }
  0xde   :  { %v549_v46 = vmax.f32 %v547_v22, %v548_v40  ;;  %v556_v9 = vrot.slane %v555_v1, 1  ;;  %v596_v18 = vrot.slane %v1129_v42, 2  ;;  %v602_v3 = vrot.slane %v1131_v56, 2 }
  0xdf   :  { %v529_v51 = vmax.f32 %v456_v60, %v528_v43  ;;  %v538_v52 = vrot.slane %v537_v27, 1  ;;  %v1146_v11 = vmax.f32 %v577_v31, %v578_v5  ;;  %v1148_v54 = vmax.f32 %v583_v63, %v584_v58 }
  0xe0   :  { %v1150_v55 = vmax.f32 %v589_v53, %v590_v0  ;;  %v543_v49 = vmax.f32 %v541_v4, %v542_v8  ;;  %v469_v16 = vmax.f32 %v1139_v2, 0.0  ;;  %v550_v20 = vrot.slane %v549_v46, 1 }
  0xe1   :  { %v530_v17 = vrot.slane %v529_v51, 2  ;;  %v345_v21 = vrot.slane %v1142_v10, 1  ;;  %v557_v22 = vmax.f32 %v555_v1, %v556_v9  ;;  %v563_v24 = vmax.f32 %v561_v19, %v562_v48 }
  0xe2   :  { %v346_v25 = vrot.slane %v1142_v10, 2  ;;  %v347_v41 = vrot.slane %v1142_v10, 3  ;;  %v539_v23 = vmax.f32 %v537_v27, %v538_v52  ;;  %v348_v28 = vrot.slane %v1142_v10, 4 }
  0xe3   :  { %v531_v26 = vmax.f32 %v529_v51, %v530_v17  ;;  %v349_v30 = vrot.slane %v1142_v10, 5  ;;  %v544_v31 = vrot.slane %v543_v49, 1  ;;  %v350_v63 = vrot.slane %v1142_v10, 6 }
  0xe4   :  { %v376_v32 = vperm.slane %v1142_v10, 0  ;;  %v377_v33 = vperm.slane %v345_v21, 0  ;;  %v551_v53 = vmax.f32 %v549_v46, %v550_v20  ;;  %v378_v36 = vperm.slane %v346_v25, 0 }
  0xe5   :  { %v532_v6 = vrot.slane %v531_v26, 1  ;;  %v379_v19 = vperm.slane %v347_v41, 0  ;;  %v380_v48 = vperm.slane %v348_v28, 0  ;;  %v381_v37 = vperm.slane %v349_v30, 0 }
  0xe6   :  { %v382_v39 = vperm.slane %v350_v63, 0  ;;  %v440_v45 = vadd.f32 %v376_v32, %v1032_v47  ;;  %v441_v58 = vadd.f32 %v377_v33, %v1046_v50  ;;  %v442_v60 = vadd.f32 %v378_v36, %v1058_v15 }
  0xe7   :  { %v533_v5 = vmax.f32 %v531_v26, %v532_v6  ;;  %v443_v62 = vadd.f32 %v379_v19, %v1069_v29  ;;  %v545_v0 = vmax.f32 %v543_v49, %v544_v31  ;;  %v444_v4 = vadd.f32 %v380_v48, %v1079_v61 }
  0xe8   :  { %v445_v40 = vadd.f32 %v381_v37, %v1111_v13  ;;  %v472_v1 = vmax.f32 %v440_v45, 0.0  ;;  %v473_v43 = vmax.f32 %v441_v58, 0.0  ;;  %v474_v27 = vmax.f32 %v442_v60, 0.0 }
  0xe9   :  { %v718_v14 = vsel %vm704_vm2, %v539_v23, %v533_v5  ;;  %v475_v8 = vmax.f32 %v443_v62, 0.0  ;;  %v446_v46 = vadd.f32 %v382_v39, %v266_v7  ;;  %v476_v9 = vmax.f32 %v444_v4, 0.0 }
  0xea   :  { %v719_v47 = vsel %vm706_vm3, %v545_v0, %v718_v14  ;;  %v477_v50 = vmax.f32 %v445_v40, 0.0  ;;  %v624_v51 = vrot.slane %v472_v1, 4  ;;  %v630_v29 = vrot.slane %v473_v43, 4  ;;  %v268_v0 = vpop.f32.mrf.mxu3 }
  0xeb   :  { %v720_v15 = vsel %vm708_vm4, %v551_v53, %v719_v47  ;;  %v636_v52 = vrot.slane %v474_v27, 4  ;;  %v606_v61 = vrot.slane %v469_v16, 4  ;;  %v642_v49 = vrot.slane %v475_v8, 4 }
  0xec   :  { %v721_v13 = vsel %vm710_vm5, %v557_v22, %v720_v15  ;;  %v648_v17 = vrot.slane %v476_v9, 4  ;;  %v625_v21 = vmax.f32 %v472_v1, %v624_v51  ;;  %v631_v25 = vmax.f32 %v473_v43, %v630_v29 }
  0xed   :  { %v722_v20 = vsel %vm712_vm6, %v563_v24, %v721_v13  ;;  %v637_v41 = vmax.f32 %v474_v27, %v636_v52  ;;  %v478_v26 = vmax.f32 %v446_v46, 0.0  ;;  %v643_v23 = vmax.f32 %v475_v8, %v642_v49 }
  0xee   :  { %v723_v7 = vsel %vm714_vm7, %v1123_v34, %v722_v20  ;;  %v654_v28 = vrot.slane %v477_v50, 4  ;;  %v626_v31 = vrot.slane %v625_v21, 2  ;;  %v632_v63 = vrot.slane %v631_v25, 2 }
  0xef   :  { %v724_v30 = vsel %vm716_vm8, %v1127_v59, %v723_v7  ;;  %v638_v32 = vrot.slane %v637_v41, 2  ;;  %v586_v22 = vrot.slane %v1148_v54, 1  ;;  %v597_v24 = vmax.f32 %v1129_v42, %v596_v18  ;;  %v241_v59 = vpop.f32.mrf.mxu2 }
  0xf0   :  { %v1184_v33 = vmax.f32 %v1131_v56, %v602_v3  ;;  %744 = vst [vmem:[%s1230_s5 + $0x8] sm:$0xff] %v724_v30  ;;  %v649_v34 = vmax.f32 %v476_v9, %v648_v17  ;;  %v627_v6 = vmax.f32 %v625_v21, %v626_v31  ;;  %v633_v53 = vmax.f32 %v631_v25, %v632_v63 }
  0xf1   :  { %v639_v36 = vmax.f32 %v637_v41, %v638_v32  ;;  %v644_v19 = vrot.slane %v643_v23, 2  ;;  %v580_v48 = vrot.slane %v1146_v11, 1  ;;  %v607_v42 = vmax.f32 %v469_v16, %v606_v61 }
  0xf2   :  { %v655_v18 = vmax.f32 %v477_v50, %v654_v28  ;;  %v660_v37 = vrot.slane %v478_v26, 4  ;;  %v628_v39 = vrot.slane %v627_v6, 1  ;;  %v634_v56 = vrot.slane %v633_v53, 1 }
  0xf3   :  { %v242_v3 = vadd.f32 %v981_v38, %v241_v59  ;;  %v343_v45 = vrot.slane %v1082_v44, 6  ;;  %v592_v5 = vrot.slane %v1150_v55, 1  ;;  %v598_v58 = vrot.slane %v597_v24, 1 }
  0xf4   :  { %v640_v60 = vrot.slane %v639_v36, 1  ;;  %v650_v62 = vrot.slane %v649_v34, 2  ;;  %v587_v4 = vmax.f32 %v1148_v54, %v586_v22  ;;  %v635_v40 = vmax.f32 %v633_v53, %v634_v56 }
  0xf5   :  { %v645_v1 = vmax.f32 %v643_v23, %v644_v19  ;;  %v374_v2 = vperm.slane %v343_v45, 0  ;;  %v608_v16 = vrot.slane %v607_v42, 2  ;;  %v656_v14 = vrot.slane %v655_v18, 2 }
  0xf6   :  { %v661_v43 = vmax.f32 %v478_v26, %v660_v37  ;;  %v619_v27 = vmax.f32 %v471_v35, %v1137_v57  ;;  %v629_v8 = vmax.f32 %v627_v6, %v628_v39  ;;  %v269_v47 = vadd.f32 %v981_v38, %v268_v0 }
  0xf7   :  { %v438_v44 = vadd.f32 %v374_v2, %v242_v3  ;;  %v351_v46 = vrot.slane %v1142_v10, 7  ;;  %v581_v9 = vmax.f32 %v1146_v11, %v580_v48  ;;  %v593_v54 = vmax.f32 %v1150_v55, %v592_v5 }
  0xf8   :  { %v641_v50 = vmax.f32 %v639_v36, %v640_v60  ;;  %v651_v15 = vmax.f32 %v649_v34, %v650_v62  ;;  %v646_v51 = vrot.slane %v645_v1, 1  ;;  %v732_v61 = vsel %vm704_vm2, %v635_v40, %v629_v8 }
  0xf9   :  { %v470_v29 = vmax.f32 %v438_v44, 0.0  ;;  %v383_v52 = vperm.slane %v351_v46, 0  ;;  %v609_v13 = vmax.f32 %v607_v42, %v608_v16  ;;  %v725_v12 = vsel %vm704_vm2, %v587_v4, %v581_v9 }
  0xfa   :  { %v662_v35 = vrot.slane %v661_v43, 2  ;;  %v620_v57 = vrot.slane %v619_v27, 2  ;;  %v657_v49 = vmax.f32 %v655_v18, %v656_v14  ;;  %v604_v10 = vrot.slane %v1184_v33, 1 }
  0xfb   :  { %v612_v38 = vrot.slane %v470_v29, 4  ;;  %v447_v17 = vadd.f32 %v383_v52, %v269_v47  ;;  %v652_v11 = vrot.slane %v651_v15, 1  ;;  %v733_v55 = vsel %vm706_vm3, %v641_v50, %v732_v61 }
  0xfc   :  { %v726_v20 = vsel %vm706_vm3, %v593_v54, %v725_v12  ;;  %v647_v21 = vmax.f32 %v645_v1, %v646_v51  ;;  %v599_v7 = vmax.f32 %v597_v24, %v598_v58  ;;  %v610_v26 = vrot.slane %v609_v13, 1 }
  0xfd   :  { %v613_v25 = vmax.f32 %v470_v29, %v612_v38  ;;  %v479_v41 = vmax.f32 %v447_v17, 0.0  ;;  %v621_v23 = vmax.f32 %v619_v27, %v620_v57  ;;  %v663_v28 = vmax.f32 %v661_v43, %v662_v35 }
  0xfe   :  { %v658_v31 = vrot.slane %v657_v49, 1  ;;  %v734_v32 = vsel %vm708_vm4, %v647_v21, %v733_v55  ;;  %v727_v22 = vsel %vm708_vm4, %v599_v7, %v726_v20  ;;  %v653_v34 = vmax.f32 %v651_v15, %v652_v11 }
  0xff   :  { %v614_v30 = vrot.slane %v613_v25, 2  ;;  %v666_v63 = vrot.slane %v479_v41, 4  ;;  %v605_v59 = vmax.f32 %v1184_v33, %v604_v10  ;;  %v611_v36 = vmax.f32 %v609_v13, %v610_v26 }
 0x100   :  { %v622_v19 = vrot.slane %v621_v23, 1  ;;  %v664_v48 = vrot.slane %v663_v28, 1  ;;  %v735_v24 = vsel %vm710_vm5, %v653_v34, %v734_v32  ;;  %v659_v37 = vmax.f32 %v657_v49, %v658_v31 }
 0x101   :  { %v615_v6 = vmax.f32 %v613_v25, %v614_v30  ;;  %v667_v53 = vmax.f32 %v479_v41, %v666_v63  ;;  %v728_v42 = vsel %vm710_vm5, %v605_v59, %v727_v22 }
 0x102   :  { %v736_v45 = vsel %vm712_vm6, %v659_v37, %v735_v24  ;;  %v729_v5 = vsel %vm712_vm6, %v611_v36, %v728_v42  ;;  %v623_v58 = vmax.f32 %v621_v23, %v622_v19  ;;  %v665_v33 = vmax.f32 %v663_v28, %v664_v48 }
 0x103   :  { %v616_v18 = vrot.slane %v615_v6, 1  ;;  %v668_v39 = vrot.slane %v667_v53, 2 }
 0x104   :  { %v737_v4 = vsel %vm714_vm7, %v665_v33, %v736_v45 }
 0x105   :  { %v617_v56 = vmax.f32 %v615_v6, %v616_v18  ;;  %v669_v3 = vmax.f32 %v667_v53, %v668_v39 }
 0x107   :  { %v730_v60 = vsel %vm714_vm7, %v617_v56, %v729_v5  ;;  %v670_v62 = vrot.slane %v669_v3, 1 }
 0x108   :  { %v731_v0 = vsel %vm716_vm8, %v623_v58, %v730_v60 }
 0x109   :  { %745 = vst [vmem:[%s1230_s5 + $0x10] sm:$0xff] %v731_v0  ;;  %v671_v40 = vmax.f32 %v669_v3, %v670_v62 }
 0x10b   :  { %v738_v1 = vsel %vm716_vm8, %v671_v40, %v737_v4 }
 0x10c   :  { %746 = vst [vmem:[%s1230_s5 + $0x18] sm:$0xff] %v738_v1 }

</bundles_post_ra>
